<compile_context>
chip_gen: v7x
topology: tpu7x:2x2x1
jax: 0.10.0
libtpu: 0.0.40
codegen_flags: <defaults>
</compile_context>

<pallas_src>
import functools

import jax
import jax.numpy as jnp
from jax.experimental import pallas as pl
from jax.experimental.pallas import tpu as pltpu


def _rnn_kernel(x_ref,       # (batch, seq, input_size)     batch-first, as given
                w_ih0_ref,   # (input_size, hidden)         pre-transposed
                b0_ref,      # (1, hidden)                  b_ih0 + b_hh0
                w_hh0_ref,   # (hidden, hidden)             pre-transposed
                w1_ref,      # (2*hidden, hidden)           [w_ih1^T ; w_hh1^T]
                b1_ref,      # (1, hidden)                  b_ih1 + b_hh1
                w_fc_ref,    # (hidden, output)             pre-transposed
                b_fc_ref,    # (1, output)
                y_ref,       # (batch*seq, output)          final layout
                hs_ref,      # VMEM scratch (batch, seq, hidden)
                *, activation):
    if activation == "tanh":
        act = jnp.tanh
    else:  # 'relu'
        act = lambda v: jnp.maximum(v, 0.0)

    batch, seq, input_size = x_ref.shape
    hidden = w_hh0_ref.shape[0]

    # ---- (1) Hoisted, time-invariant layer-0 input projection:
    # ONE flat 2-D MXU matmul over all (b, t) rows, bias pre-folded.
    x_flat = x_ref[...].reshape(batch * seq, input_size)
    xp = (jnp.dot(x_flat, w_ih0_ref[...], preferred_element_type=jnp.float32)
          + b0_ref[...])                                   # (batch*seq, hidden)
    xp = xp.reshape(batch, seq, hidden)                    # rows stay (b, t)-major

    # ---- (2) Hoist loop-invariant ref loads / bias broadcast out of the
    # unrolled recurrence (they are NOT CSE'd if left inside the loop).
    w_hh0 = w_hh0_ref[...]
    w1 = w1_ref[...]
    b1 = jnp.broadcast_to(b1_ref[...], (batch, hidden))

    # ---- (3) Serial recurrence: 2 small dots per step (layer-0 hh + fused
    # layer-1). Static Python loop (seq is tiny) -> all indices static.
    h0 = jnp.zeros((batch, hidden), jnp.float32)           # default hx=None path
    h1 = jnp.zeros((batch, hidden), jnp.float32)
    for t in range(seq):
        h0 = act(xp[:, t, :]
                 + jnp.dot(h0, w_hh0, preferred_element_type=jnp.float32))
        h1 = act(jnp.dot(jnp.concatenate([h0, h1], axis=-1), w1,
                         preferred_element_type=jnp.float32)
                 + b1)
        hs_ref[:, t, :] = h1                               # batch-major staging

    # ---- (4) Hoisted fc: ONE flat 2-D matmul; the store is already the exact
    # (batch*seq, output) slab the caller needs -> single writeback DMA.
    hs_flat = hs_ref[...].reshape(batch * seq, hidden)
    y_ref[...] = (jnp.dot(hs_flat, w_fc_ref[...],
                          preferred_element_type=jnp.float32)
                  + b_fc_ref[...]).astype(y_ref.dtype)


def simple_rnn_forward(x, params, activation="tanh"):
    """x: (batch, seq, input_size)  ->  (batch*seq, output_size)."""
    batch, seq, input_size = x.shape
    hidden = params["w_hh0"].shape[0]
    output_size = params["w_fc"].shape[0]

    # Pre-transpose weights; fuse layer-1's two weights; fold per-cell biases.
    w_ih0 = params["w_ih0"].T                                        # (in, hidden)
    w_hh0 = params["w_hh0"].T                                        # (hidden, hidden)
    w1 = jnp.concatenate([params["w_ih1"].T, params["w_hh1"].T], 0)  # (2*hidden, hidden)
    w_fc = params["w_fc"].T                                          # (hidden, out)
    b0 = (params["b_ih0"] + params["b_hh0"]).reshape(1, hidden)
    b1 = (params["b_ih1"] + params["b_hh1"]).reshape(1, hidden)
    b_fc = params["b_fc"].reshape(1, output_size)

    vmem = pl.BlockSpec(memory_space=pltpu.MemorySpace.VMEM)         # whole array in VMEM

    y = pl.pallas_call(
        functools.partial(_rnn_kernel, activation=activation),
        out_shape=jax.ShapeDtypeStruct((batch * seq, output_size), jnp.float32),
        in_specs=[vmem] * 8,
        out_specs=vmem,
        scratch_shapes=[
            pltpu.VMEM((batch, seq, hidden), jnp.float32),           # hs: per-step h1
        ],
    )(x.astype(jnp.float32), w_ih0, b0, w_hh0, w1, b1, w_fc, b_fc)

    return y   # already (batch*seq, output) in the PyTorch row order


def rnn_reference(x, params, activation="tanh"):
    """Pure-JAX replica of the PyTorch forward for verification."""
    act = jnp.tanh if activation == "tanh" else (lambda v: jnp.maximum(v, 0.0))
    batch, seq, _ = x.shape
    hidden = params["w_hh0"].shape[0]
    h0 = jnp.zeros((batch, hidden), jnp.float32)
    h1 = jnp.zeros((batch, hidden), jnp.float32)
    outs = []
    for t in range(seq):
        h0 = act(x[:, t] @ params["w_ih0"].T + params["b_ih0"]
                 + h0 @ params["w_hh0"].T + params["b_hh0"])
        h1 = act(h0 @ params["w_ih1"].T + params["b_ih1"]
                 + h1 @ params["w_hh1"].T + params["b_hh1"])
        outs.append(h1)
    out = jnp.stack(outs)                      # (seq, batch, hidden)
    out = jnp.transpose(out, (1, 0, 2))        # einsum('ijk->jik')
    out = out.reshape(-1, hidden)              # .view(-1, hidden)
    return out @ params["w_fc"].T + params["b_fc"]


if __name__ == "__main__":
    # Shapes consistent with the module: input_size=4, hidden=32, num_layers=2,
    # output_size=8, batch=2, seq=8, bias=True, activation='tanh'.
    batch, seq = 2, 8
    input_size, hidden, output_size = 4, 32, 8

    key = jax.random.PRNGKey(0)
    keys = jax.random.split(key, 11)
    bound = 1.0 / (hidden ** 0.5)

    def u(k, shape):
        return jax.random.uniform(k, shape, jnp.float32, -bound, bound)

    params = dict(
        w_ih0=u(keys[0], (hidden, input_size)), b_ih0=u(keys[1], (hidden,)),
        w_hh0=u(keys[2], (hidden, hidden)),     b_hh0=u(keys[3], (hidden,)),
        w_ih1=u(keys[4], (hidden, hidden)),     b_ih1=u(keys[5], (hidden,)),
        w_hh1=u(keys[6], (hidden, hidden)),     b_hh1=u(keys[7], (hidden,)),
        w_fc=u(keys[8], (output_size, hidden)), b_fc=u(keys[9], (output_size,)),
    )
    x = jax.random.normal(keys[10], (batch, seq, input_size), jnp.float32)

    out = simple_rnn_forward(x, params, activation="tanh")
    out = jax.block_until_ready(out)

    ref = rnn_reference(x, params, activation="tanh")
    assert out.shape == (batch * seq, output_size), out.shape
    assert jnp.allclose(out, ref, atol=1e-5, rtol=1e-5), float(jnp.abs(out - ref).max())
    print("KERNEL_OK")
</pallas_src>

<mosaic_0001>
module attributes {stable_mosaic.version = 11 : i64} {
  func.func @_rnn_kernel(%arg0: memref<2x8x4xf32, #tpu.memory_space<vmem>>, %arg1: memref<4x32xf32, #tpu.memory_space<vmem>>, %arg2: memref<1x32xf32, #tpu.memory_space<vmem>>, %arg3: memref<32x32xf32, #tpu.memory_space<vmem>>, %arg4: memref<64x32xf32, #tpu.memory_space<vmem>>, %arg5: memref<1x32xf32, #tpu.memory_space<vmem>>, %arg6: memref<32x8xf32, #tpu.memory_space<vmem>>, %arg7: memref<1x8xf32, #tpu.memory_space<vmem>>, %arg8: memref<16x8xf32, #tpu.memory_space<vmem>>, %arg9: memref<2x8x32xf32, #tpu.memory_space<vmem>>) attributes {dimension_semantics = [], scalar_prefetch = 0 : i64, scratch_operands = 1 : i64, tpu.core_type = #tpu.core_type<tc>} {
    %c0 = arith.constant 0 : index
    %c0_0 = arith.constant 0 : index
    %c0_1 = arith.constant 0 : index
    %0 = vector.load %arg0[%c0, %c0_0, %c0_1] : memref<2x8x4xf32, #tpu.memory_space<vmem>>, vector<2x8x4xf32>
    %1 = vector.shape_cast %0 : vector<2x8x4xf32> to vector<16x4xf32>
    %c0_2 = arith.constant 0 : index
    %c0_3 = arith.constant 0 : index
    %2 = vector.load %arg1[%c0_2, %c0_3] : memref<4x32xf32, #tpu.memory_space<vmem>>, vector<4x32xf32>
    %cst = arith.constant dense<0.000000e+00> : vector<16x32xf32>
    %3 = tpu.matmul %1, %2, %cst {dimension_numbers = #tpu.dot_dimension_numbers<[1], [0], [0], [1], [0, 0, 1, 1], [], []>} : vector<16x4xf32>, vector<4x32xf32>, vector<16x32xf32> -> vector<16x32xf32>
    %c0_4 = arith.constant 0 : index
    %c0_5 = arith.constant 0 : index
    %4 = vector.load %arg2[%c0_4, %c0_5] : memref<1x32xf32, #tpu.memory_space<vmem>>, vector<1x32xf32>
    %5 = vector.broadcast %4 : vector<1x32xf32> to vector<16x32xf32>
    %6 = arith.addf %3, %5 : vector<16x32xf32>
    %7 = vector.shape_cast %6 : vector<16x32xf32> to vector<2x8x32xf32>
    %c0_6 = arith.constant 0 : index
    %c0_7 = arith.constant 0 : index
    %8 = vector.load %arg3[%c0_6, %c0_7] : memref<32x32xf32, #tpu.memory_space<vmem>>, vector<32x32xf32>
    %c0_8 = arith.constant 0 : index
    %c0_9 = arith.constant 0 : index
    %9 = vector.load %arg4[%c0_8, %c0_9] : memref<64x32xf32, #tpu.memory_space<vmem>>, vector<64x32xf32>
    %c0_10 = arith.constant 0 : index
    %c0_11 = arith.constant 0 : index
    %10 = vector.load %arg5[%c0_10, %c0_11] : memref<1x32xf32, #tpu.memory_space<vmem>>, vector<1x32xf32>
    %11 = vector.shape_cast %10 : vector<1x32xf32> to vector<1x32xf32>
    %12 = vector.broadcast %11 : vector<1x32xf32> to vector<2x32xf32>
    %cst_12 = arith.constant 0.000000e+00 : f32
    %13 = vector.broadcast %cst_12 : f32 to vector<2x32xf32>
    %cst_13 = arith.constant 0.000000e+00 : f32
    %14 = vector.broadcast %cst_13 : f32 to vector<2x32xf32>
    %15 = vector.extract_strided_slice %7 {offsets = [0, 0, 0], sizes = [2, 1, 32], strides = [1, 1, 1]} : vector<2x8x32xf32> to vector<2x1x32xf32>
    %16 = vector.shape_cast %15 : vector<2x1x32xf32> to vector<2x32xf32>
    %cst_14 = arith.constant dense<0.000000e+00> : vector<2x32xf32>
    %17 = tpu.matmul %13, %8, %cst_14 {dimension_numbers = #tpu.dot_dimension_numbers<[1], [0], [0], [1], [0, 0, 1, 1], [], []>} : vector<2x32xf32>, vector<32x32xf32>, vector<2x32xf32> -> vector<2x32xf32>
    %18 = arith.addf %16, %17 : vector<2x32xf32>
    %19 = math.tanh %18 : vector<2x32xf32>
    %20 = tpu.concatenate %19, %14 in 1 : vector<2x32xf32>, vector<2x32xf32> -> vector<2x64xf32>
    %cst_15 = arith.constant dense<0.000000e+00> : vector<2x32xf32>
    %21 = tpu.matmul %20, %9, %cst_15 {dimension_numbers = #tpu.dot_dimension_numbers<[1], [0], [0], [1], [0, 0, 1, 1], [], []>} : vector<2x64xf32>, vector<64x32xf32>, vector<2x32xf32> -> vector<2x32xf32>
    %22 = arith.addf %21, %12 : vector<2x32xf32>
    %23 = math.tanh %22 : vector<2x32xf32>
    %c0_16 = arith.constant 0 : index
    %c0_17 = arith.constant 0 : index
    %c0_18 = arith.constant 0 : index
    %24 = vector.load %arg9[%c0_16, %c0_17, %c0_18] : memref<2x8x32xf32, #tpu.memory_space<vmem>>, vector<2x1x32xf32>
    %25 = vector.shape_cast %24 : vector<2x1x32xf32> to vector<2x32xf32>
    %26 = vector.shape_cast %23 : vector<2x32xf32> to vector<2x1x32xf32>
    tpu.vector_store %arg9[%c0_16, %c0_17, %c0_18], %26 {strides = array<i32>} : memref<2x8x32xf32, #tpu.memory_space<vmem>>, vector<2x1x32xf32>,
    %27 = vector.extract_strided_slice %7 {offsets = [0, 1, 0], sizes = [2, 1, 32], strides = [1, 1, 1]} : vector<2x8x32xf32> to vector<2x1x32xf32>
    %28 = vector.shape_cast %27 : vector<2x1x32xf32> to vector<2x32xf32>
    %cst_19 = arith.constant dense<0.000000e+00> : vector<2x32xf32>
    %29 = tpu.matmul %19, %8, %cst_19 {dimension_numbers = #tpu.dot_dimension_numbers<[1], [0], [0], [1], [0, 0, 1, 1], [], []>} : vector<2x32xf32>, vector<32x32xf32>, vector<2x32xf32> -> vector<2x32xf32>
    %30 = arith.addf %28, %29 : vector<2x32xf32>
    %31 = math.tanh %30 : vector<2x32xf32>
    %32 = tpu.concatenate %31, %23 in 1 : vector<2x32xf32>, vector<2x32xf32> -> vector<2x64xf32>
    %cst_20 = arith.constant dense<0.000000e+00> : vector<2x32xf32>
    %33 = tpu.matmul %32, %9, %cst_20 {dimension_numbers = #tpu.dot_dimension_numbers<[1], [0], [0], [1], [0, 0, 1, 1], [], []>} : vector<2x64xf32>, vector<64x32xf32>, vector<2x32xf32> -> vector<2x32xf32>
    %34 = arith.addf %33, %12 : vector<2x32xf32>
    %35 = math.tanh %34 : vector<2x32xf32>
    %c0_21 = arith.constant 0 : index
    %c1 = arith.constant 1 : index
    %c0_22 = arith.constant 0 : index
    %36 = vector.load %arg9[%c0_21, %c1, %c0_22] : memref<2x8x32xf32, #tpu.memory_space<vmem>>, vector<2x1x32xf32>
    %37 = vector.shape_cast %36 : vector<2x1x32xf32> to vector<2x32xf32>
    %38 = vector.shape_cast %35 : vector<2x32xf32> to vector<2x1x32xf32>
    tpu.vector_store %arg9[%c0_21, %c1, %c0_22], %38 {strides = array<i32>} : memref<2x8x32xf32, #tpu.memory_space<vmem>>, vector<2x1x32xf32>,
    %39 = vector.extract_strided_slice %7 {offsets = [0, 2, 0], sizes = [2, 1, 32], strides = [1, 1, 1]} : vector<2x8x32xf32> to vector<2x1x32xf32>
    %40 = vector.shape_cast %39 : vector<2x1x32xf32> to vector<2x32xf32>
    %cst_23 = arith.constant dense<0.000000e+00> : vector<2x32xf32>
    %41 = tpu.matmul %31, %8, %cst_23 {dimension_numbers = #tpu.dot_dimension_numbers<[1], [0], [0], [1], [0, 0, 1, 1], [], []>} : vector<2x32xf32>, vector<32x32xf32>, vector<2x32xf32> -> vector<2x32xf32>
    %42 = arith.addf %40, %41 : vector<2x32xf32>
    %43 = math.tanh %42 : vector<2x32xf32>
    %44 = tpu.concatenate %43, %35 in 1 : vector<2x32xf32>, vector<2x32xf32> -> vector<2x64xf32>
    %cst_24 = arith.constant dense<0.000000e+00> : vector<2x32xf32>
    %45 = tpu.matmul %44, %9, %cst_24 {dimension_numbers = #tpu.dot_dimension_numbers<[1], [0], [0], [1], [0, 0, 1, 1], [], []>} : vector<2x64xf32>, vector<64x32xf32>, vector<2x32xf32> -> vector<2x32xf32>
    %46 = arith.addf %45, %12 : vector<2x32xf32>
    %47 = math.tanh %46 : vector<2x32xf32>
    %c0_25 = arith.constant 0 : index
    %c2 = arith.constant 2 : index
    %c0_26 = arith.constant 0 : index
    %48 = vector.load %arg9[%c0_25, %c2, %c0_26] : memref<2x8x32xf32, #tpu.memory_space<vmem>>, vector<2x1x32xf32>
    %49 = vector.shape_cast %48 : vector<2x1x32xf32> to vector<2x32xf32>
    %50 = vector.shape_cast %47 : vector<2x32xf32> to vector<2x1x32xf32>
    tpu.vector_store %arg9[%c0_25, %c2, %c0_26], %50 {strides = array<i32>} : memref<2x8x32xf32, #tpu.memory_space<vmem>>, vector<2x1x32xf32>,
    %51 = vector.extract_strided_slice %7 {offsets = [0, 3, 0], sizes = [2, 1, 32], strides = [1, 1, 1]} : vector<2x8x32xf32> to vector<2x1x32xf32>
    %52 = vector.shape_cast %51 : vector<2x1x32xf32> to vector<2x32xf32>
    %cst_27 = arith.constant dense<0.000000e+00> : vector<2x32xf32>
    %53 = tpu.matmul %43, %8, %cst_27 {dimension_numbers = #tpu.dot_dimension_numbers<[1], [0], [0], [1], [0, 0, 1, 1], [], []>} : vector<2x32xf32>, vector<32x32xf32>, vector<2x32xf32> -> vector<2x32xf32>
    %54 = arith.addf %52, %53 : vector<2x32xf32>
    %55 = math.tanh %54 : vector<2x32xf32>
    %56 = tpu.concatenate %55, %47 in 1 : vector<2x32xf32>, vector<2x32xf32> -> vector<2x64xf32>
    %cst_28 = arith.constant dense<0.000000e+00> : vector<2x32xf32>
    %57 = tpu.matmul %56, %9, %cst_28 {dimension_numbers = #tpu.dot_dimension_numbers<[1], [0], [0], [1], [0, 0, 1, 1], [], []>} : vector<2x64xf32>, vector<64x32xf32>, vector<2x32xf32> -> vector<2x32xf32>
    %58 = arith.addf %57, %12 : vector<2x32xf32>
    %59 = math.tanh %58 : vector<2x32xf32>
    %c0_29 = arith.constant 0 : index
    %c3 = arith.constant 3 : index
    %c0_30 = arith.constant 0 : index
    %60 = vector.load %arg9[%c0_29, %c3, %c0_30] : memref<2x8x32xf32, #tpu.memory_space<vmem>>, vector<2x1x32xf32>
    %61 = vector.shape_cast %60 : vector<2x1x32xf32> to vector<2x32xf32>
    %62 = vector.shape_cast %59 : vector<2x32xf32> to vector<2x1x32xf32>
    tpu.vector_store %arg9[%c0_29, %c3, %c0_30], %62 {strides = array<i32>} : memref<2x8x32xf32, #tpu.memory_space<vmem>>, vector<2x1x32xf32>,
    %63 = vector.extract_strided_slice %7 {offsets = [0, 4, 0], sizes = [2, 1, 32], strides = [1, 1, 1]} : vector<2x8x32xf32> to vector<2x1x32xf32>
    %64 = vector.shape_cast %63 : vector<2x1x32xf32> to vector<2x32xf32>
    %cst_31 = arith.constant dense<0.000000e+00> : vector<2x32xf32>
    %65 = tpu.matmul %55, %8, %cst_31 {dimension_numbers = #tpu.dot_dimension_numbers<[1], [0], [0], [1], [0, 0, 1, 1], [], []>} : vector<2x32xf32>, vector<32x32xf32>, vector<2x32xf32> -> vector<2x32xf32>
    %66 = arith.addf %64, %65 : vector<2x32xf32>
    %67 = math.tanh %66 : vector<2x32xf32>
    %68 = tpu.concatenate %67, %59 in 1 : vector<2x32xf32>, vector<2x32xf32> -> vector<2x64xf32>
    %cst_32 = arith.constant dense<0.000000e+00> : vector<2x32xf32>
    %69 = tpu.matmul %68, %9, %cst_32 {dimension_numbers = #tpu.dot_dimension_numbers<[1], [0], [0], [1], [0, 0, 1, 1], [], []>} : vector<2x64xf32>, vector<64x32xf32>, vector<2x32xf32> -> vector<2x32xf32>
    %70 = arith.addf %69, %12 : vector<2x32xf32>
    %71 = math.tanh %70 : vector<2x32xf32>
    %c0_33 = arith.constant 0 : index
    %c4 = arith.constant 4 : index
    %c0_34 = arith.constant 0 : index
    %72 = vector.load %arg9[%c0_33, %c4, %c0_34] : memref<2x8x32xf32, #tpu.memory_space<vmem>>, vector<2x1x32xf32>
    %73 = vector.shape_cast %72 : vector<2x1x32xf32> to vector<2x32xf32>
    %74 = vector.shape_cast %71 : vector<2x32xf32> to vector<2x1x32xf32>
    tpu.vector_store %arg9[%c0_33, %c4, %c0_34], %74 {strides = array<i32>} : memref<2x8x32xf32, #tpu.memory_space<vmem>>, vector<2x1x32xf32>,
    %75 = vector.extract_strided_slice %7 {offsets = [0, 5, 0], sizes = [2, 1, 32], strides = [1, 1, 1]} : vector<2x8x32xf32> to vector<2x1x32xf32>
    %76 = vector.shape_cast %75 : vector<2x1x32xf32> to vector<2x32xf32>
    %cst_35 = arith.constant dense<0.000000e+00> : vector<2x32xf32>
    %77 = tpu.matmul %67, %8, %cst_35 {dimension_numbers = #tpu.dot_dimension_numbers<[1], [0], [0], [1], [0, 0, 1, 1], [], []>} : vector<2x32xf32>, vector<32x32xf32>, vector<2x32xf32> -> vector<2x32xf32>
    %78 = arith.addf %76, %77 : vector<2x32xf32>
    %79 = math.tanh %78 : vector<2x32xf32>
    %80 = tpu.concatenate %79, %71 in 1 : vector<2x32xf32>, vector<2x32xf32> -> vector<2x64xf32>
    %cst_36 = arith.constant dense<0.000000e+00> : vector<2x32xf32>
    %81 = tpu.matmul %80, %9, %cst_36 {dimension_numbers = #tpu.dot_dimension_numbers<[1], [0], [0], [1], [0, 0, 1, 1], [], []>} : vector<2x64xf32>, vector<64x32xf32>, vector<2x32xf32> -> vector<2x32xf32>
    %82 = arith.addf %81, %12 : vector<2x32xf32>
    %83 = math.tanh %82 : vector<2x32xf32>
    %c0_37 = arith.constant 0 : index
    %c5 = arith.constant 5 : index
    %c0_38 = arith.constant 0 : index
    %84 = vector.load %arg9[%c0_37, %c5, %c0_38] : memref<2x8x32xf32, #tpu.memory_space<vmem>>, vector<2x1x32xf32>
    %85 = vector.shape_cast %84 : vector<2x1x32xf32> to vector<2x32xf32>
    %86 = vector.shape_cast %83 : vector<2x32xf32> to vector<2x1x32xf32>
    tpu.vector_store %arg9[%c0_37, %c5, %c0_38], %86 {strides = array<i32>} : memref<2x8x32xf32, #tpu.memory_space<vmem>>, vector<2x1x32xf32>,
    %87 = vector.extract_strided_slice %7 {offsets = [0, 6, 0], sizes = [2, 1, 32], strides = [1, 1, 1]} : vector<2x8x32xf32> to vector<2x1x32xf32>
    %88 = vector.shape_cast %87 : vector<2x1x32xf32> to vector<2x32xf32>
    %cst_39 = arith.constant dense<0.000000e+00> : vector<2x32xf32>
    %89 = tpu.matmul %79, %8, %cst_39 {dimension_numbers = #tpu.dot_dimension_numbers<[1], [0], [0], [1], [0, 0, 1, 1], [], []>} : vector<2x32xf32>, vector<32x32xf32>, vector<2x32xf32> -> vector<2x32xf32>
    %90 = arith.addf %88, %89 : vector<2x32xf32>
    %91 = math.tanh %90 : vector<2x32xf32>
    %92 = tpu.concatenate %91, %83 in 1 : vector<2x32xf32>, vector<2x32xf32> -> vector<2x64xf32>
    %cst_40 = arith.constant dense<0.000000e+00> : vector<2x32xf32>
    %93 = tpu.matmul %92, %9, %cst_40 {dimension_numbers = #tpu.dot_dimension_numbers<[1], [0], [0], [1], [0, 0, 1, 1], [], []>} : vector<2x64xf32>, vector<64x32xf32>, vector<2x32xf32> -> vector<2x32xf32>
    %94 = arith.addf %93, %12 : vector<2x32xf32>
    %95 = math.tanh %94 : vector<2x32xf32>
    %c0_41 = arith.constant 0 : index
    %c6 = arith.constant 6 : index
    %c0_42 = arith.constant 0 : index
    %96 = vector.load %arg9[%c0_41, %c6, %c0_42] : memref<2x8x32xf32, #tpu.memory_space<vmem>>, vector<2x1x32xf32>
    %97 = vector.shape_cast %96 : vector<2x1x32xf32> to vector<2x32xf32>
    %98 = vector.shape_cast %95 : vector<2x32xf32> to vector<2x1x32xf32>
    tpu.vector_store %arg9[%c0_41, %c6, %c0_42], %98 {strides = array<i32>} : memref<2x8x32xf32, #tpu.memory_space<vmem>>, vector<2x1x32xf32>,
    %99 = vector.extract_strided_slice %7 {offsets = [0, 7, 0], sizes = [2, 1, 32], strides = [1, 1, 1]} : vector<2x8x32xf32> to vector<2x1x32xf32>
    %100 = vector.shape_cast %99 : vector<2x1x32xf32> to vector<2x32xf32>
    %cst_43 = arith.constant dense<0.000000e+00> : vector<2x32xf32>
    %101 = tpu.matmul %91, %8, %cst_43 {dimension_numbers = #tpu.dot_dimension_numbers<[1], [0], [0], [1], [0, 0, 1, 1], [], []>} : vector<2x32xf32>, vector<32x32xf32>, vector<2x32xf32> -> vector<2x32xf32>
    %102 = arith.addf %100, %101 : vector<2x32xf32>
    %103 = math.tanh %102 : vector<2x32xf32>
    %104 = tpu.concatenate %103, %95 in 1 : vector<2x32xf32>, vector<2x32xf32> -> vector<2x64xf32>
    %cst_44 = arith.constant dense<0.000000e+00> : vector<2x32xf32>
    %105 = tpu.matmul %104, %9, %cst_44 {dimension_numbers = #tpu.dot_dimension_numbers<[1], [0], [0], [1], [0, 0, 1, 1], [], []>} : vector<2x64xf32>, vector<64x32xf32>, vector<2x32xf32> -> vector<2x32xf32>
    %106 = arith.addf %105, %12 : vector<2x32xf32>
    %107 = math.tanh %106 : vector<2x32xf32>
    %c0_45 = arith.constant 0 : index
    %c7 = arith.constant 7 : index
    %c0_46 = arith.constant 0 : index
    %108 = vector.load %arg9[%c0_45, %c7, %c0_46] : memref<2x8x32xf32, #tpu.memory_space<vmem>>, vector<2x1x32xf32>
    %109 = vector.shape_cast %108 : vector<2x1x32xf32> to vector<2x32xf32>
    %110 = vector.shape_cast %107 : vector<2x32xf32> to vector<2x1x32xf32>
    tpu.vector_store %arg9[%c0_45, %c7, %c0_46], %110 {strides = array<i32>} : memref<2x8x32xf32, #tpu.memory_space<vmem>>, vector<2x1x32xf32>,
    %c0_47 = arith.constant 0 : index
    %c0_48 = arith.constant 0 : index
    %c0_49 = arith.constant 0 : index
    %111 = vector.load %arg9[%c0_47, %c0_48, %c0_49] : memref<2x8x32xf32, #tpu.memory_space<vmem>>, vector<2x8x32xf32>
    %112 = vector.shape_cast %111 : vector<2x8x32xf32> to vector<16x32xf32>
    %c0_50 = arith.constant 0 : index
    %c0_51 = arith.constant 0 : index
    %113 = vector.load %arg6[%c0_50, %c0_51] : memref<32x8xf32, #tpu.memory_space<vmem>>, vector<32x8xf32>
    %cst_52 = arith.constant dense<0.000000e+00> : vector<16x8xf32>
    %114 = tpu.matmul %112, %113, %cst_52 {dimension_numbers = #tpu.dot_dimension_numbers<[1], [0], [0], [1], [0, 0, 1, 1], [], []>} : vector<16x32xf32>, vector<32x8xf32>, vector<16x8xf32> -> vector<16x8xf32>
    %c0_53 = arith.constant 0 : index
    %c0_54 = arith.constant 0 : index
    %115 = vector.load %arg7[%c0_53, %c0_54] : memref<1x8xf32, #tpu.memory_space<vmem>>, vector<1x8xf32>
    %116 = vector.broadcast %115 : vector<1x8xf32> to vector<16x8xf32>
    %117 = arith.addf %114, %116 : vector<16x8xf32>
    %c0_55 = arith.constant 0 : index
    %c0_56 = arith.constant 0 : index
    %118 = vector.load %arg8[%c0_55, %c0_56] : memref<16x8xf32, #tpu.memory_space<vmem>>, vector<16x8xf32>
    tpu.vector_store %arg8[%c0_55, %c0_56], %117 {strides = array<i32>} : memref<16x8xf32, #tpu.memory_space<vmem>>, vector<16x8xf32>,
    return
  }
}

</mosaic_0001>

<bundles_post_ra>
// kernel: tpu_custom_call.1
= control target key start
LH: loop header
LB: loop body
LE: loop exit
PB: predicated region body
PF: predicated region fallthrough
CT: control target
= control target key end

     0   :  { %vm46_vm0 = vcmask 1043456   ;;  %vm39_vm1 = vcmask 31744   ;;  %v2420_v0 = vmov 0.0|0.0   ;;  %vm2421_vm2 = vmmov 0   ;;  %s2799_s3 = inlined_call_operand.vmem [shape: f32[32,32], index: 3, kind: input, shape index: {}]   ;;  %s2800_s1 = inlined_call_operand.vmem [shape: f32[4,32], index: 1, kind: input, shape index: {}]   ;;  %s2801_s0 = inlined_call_operand.vmem [shape: f32[2,8,4], index: 0, kind: input, shape index: {}]   ;;  %s2802_s4 = inlined_call_operand.vmem [shape: f32[64,32], index: 4, kind: input, shape index: {}]   ;;  %s2803_s2 = inlined_call_operand.vmem [shape: f32[1,32], index: 2, kind: input, shape index: {}]   ;;  %s2804_s5 = inlined_call_operand.vmem [shape: f32[1,32], index: 5, kind: input, shape index: {}]   ;;  %s2805_s6 = inlined_call_operand.vmem [shape: f32[32,8], index: 6, kind: input, shape index: {}]   ;;  %s2806_s7 = inlined_call_operand.vmem [shape: f32[1,8], index: 7, kind: input, shape index: {}]   ;;  %s2807_s8 = inlined_call_operand.vmem [shape: f32[16,8], index: 8, kind: output, shape index: {}]  }
   0x1   :  { %2215 = vmatprep.subr.bf16.mxu1 %v2420_v0  ;;  %v125_v1 = vld [vmem:[%s2799_s3] sm:$0xff]  ;;  %v126_v2 = vld [vmem:[%s2799_s3 + $0x8] sm:$0xff]  ;;  %v127_v7 = vld [vmem:[%s2799_s3 + $0x10] sm:$0xff]  ;;  %v2422_v8 = vmov 0.0   ;;  %vm229_vm3 = vcmask 1041409   ;;  %vm144_vm4 = vcmask 261120   ;;  %v312_v49 = vlaneseq }
   0x2   :  { %v31_v3 = vld [vmem:[%s2800_s1] sm:$0xf]  ;;  %v2480_v4 = vpack.c.bf16 %v126_v2, %v125_v1  ;;  %v30_v6 = vld [vmem:[%s2801_s0 + $0x8] sm:$0xff]  ;;  %1972 = vmatprep.mubr.msk.f32.mxu1 %vm2421_vm2, %v2422_v8  ;;  %v128_v9 = vld [vmem:[%s2799_s3 + $0x18] sm:$0xff]  ;;  %vm233_vm5 = vcmask 523264   ;;  %vm419_vm6 = vcmask 1042434  }
   0x3   :  { %1959 = vmatprep.subr.msk.mxu0 %vm46_vm0, %v31_v3  ;;  %v29_v5 = vld [vmem:[%s2801_s0] sm:$0xff]  ;;  %v2501_v10 = vpack.c.bf16 %v128_v9, %v127_v7  ;;  %v130_v12 = vld [vmem:[%s2802_s4 + $0x8] sm:$0xff]  ;;  %v131_v14 = vld [vmem:[%s2802_s4 + $0x10] sm:$0xff]  ;;  %v2423_v47 = vmov 1966171168   ;;  %v313_v51 = vshrl.u32 %v312_v49, 7 }
   0x4   :  { %1960 = vmatpush3.msk.msra.mxu0 %vm46_vm0, %v31_v3  ;;  %1961 = vmatprep.mubr.msk.f32.mxu0 %vm39_vm1, %v29_v5  ;;  %v129_v11 = vld [vmem:[%s2802_s4] sm:$0xff]  ;;  %v132_v15 = vld [vmem:[%s2802_s4 + $0x18] sm:$0xff]  ;;  %v134_v18 = vld [vmem:[%s2802_s4 + $0x28] sm:$0xff]  ;;  %v310_v48 = vunpack.c.l.s4 %v2423_v47  ;;  %vm333_vm7 = vcmask 253952   ;;  %vm615_vm8 = vcmask 1043459   ;;  %vm812_vm9 = vcmask 1044484  }
   0x5   :  { %2217 = vmatpush3.bf16.msra.mxu1 %v2480_v4  ;;  %1962 = vmatmul.mubr.msk.f32.vlgmr.msra.gmra.mrb[0].mxu0 %vm39_vm1, %v30_v6  ;;  %v2522_v13 = vpack.c.bf16 %v130_v12, %v129_v11  ;;  %v2532_v16 = vpack.c.bf16 %v132_v15, %v131_v14  ;;  %v133_v17 = vld [vmem:[%s2802_s4 + $0x20] sm:$0xff]  ;;  %v135_v20 = vld [vmem:[%s2802_s4 + $0x30] sm:$0xff]  ;;  %v136_v21 = vld [vmem:[%s2802_s4 + $0x38] sm:$0xff]  ;;  %vm1009_vm10 = vcmask 1045509   ;;  %vm1206_vm11 = vcmask 1046534  }
   0x6   :  { %2218 = vmatprep.subr.bf16.mxu1 %v2420_v0  ;;  %2221 = vmatprep.subr.bf16.mxu0 %v2420_v0  ;;  %v2542_v19 = vpack.c.bf16 %v134_v18, %v133_v17  ;;  %v2552_v22 = vpack.c.bf16 %v136_v21, %v135_v20  ;;  %v1815_v25 = vld [vmem:[%s2803_s2] ss:$0 sm:$0xff]  ;;  %v311_v50 = vunpack.c.0.s8 %v310_v48  ;;  %vm1403_vm12 = vcmask 1047559  }
   0x7   :  { %1991 = vmatprep.mubr.msk.f32.mxu0 %vm2421_vm2, %v2422_v8  ;;  %2223 = vmatpush3.bf16.msra.mxu0 %v2522_v13  ;;  %v2588_v38 = vld [vmem:[%s2804_s5] ss:$0 sm:$0xff]  ;;  %s2424_s5 = smov 32   ;;  %vm1610_vm13 = vcmask 1040384   ;;  %vm1808_vm14 = vcmask 64512  }
   0x8   :  { %2224 = vmatprep.subr.bf16.mxu0 %v2420_v0  ;;  %v2593_v52 = vsub.s32 %v311_v50, %v313_v51 }
   0x9   :  { %2220 = vmatpush3.bf16.msra.mxu1 %v2501_v10 }
   0xa   :  { %2233 = vmatprep.subr.bf16.mxu1 %v2420_v0 }
   0xb   :  { %2226 = vmatpush3.bf16.msra.mxu0 %v2532_v16 }
   0xc   :  { %1973 = vmatmul.mubr.f32.vlgmr.msra.gmra.mrb[0].mxu1 %v2422_v8  ;;  %2227 = vmatprep.subr.bf16.mxu0 %v2420_v0 }
   0xd   :  { %2235 = vmatpush3.bf16.msra.mxu1 %v2480_v4  ;;  %2002 = vmatprep.mubr.msk.f32.mxu1 %vm2421_vm2, %v2422_v8 }
   0xe   :  { %2236 = vmatprep.subr.bf16.mxu1 %v2420_v0 }
   0xf   :  { %2229 = vmatpush3.bf16.msra.mxu0 %v2542_v19 }
  0x10   :  { %2230 = vmatprep.subr.bf16.mxu0 %v2420_v0 }
  0x11   :  { %2238 = vmatpush3.bf16.msra.mxu1 %v2501_v10 }
  0x12   :  { %2239 = vmatprep.subr.bf16.mxu1 %v2420_v0 }
  0x13   :  { %2232 = vmatpush3.bf16.msra.mxu0 %v2552_v22 }
  0x14   :  { %2251 = vmatprep.subr.bf16.mxu0 %v2420_v0 }
  0xd8   :  { %v1963_v23 = vpop.f32.mrb[0].mxu0 }
  0xd9   :  { %v116_v24 = vpop.f32.mrb[1].mxu0  ;;  %v2559_v26 = vadd.f32 %v1963_v23, %v1815_v25 }
  0xda   :  { %v2561_v27 = vadd.f32 %v1815_v25, %v116_v24 }
  0xdf   :  { %v214_v28 = vpop.f32.mrb[0].mxu1 }
  0xe0   :  { %v219_v29 = vrot.slane %v214_v28, 1  ;;  %v1974_v30 = vpop.f32.mrb[1].mxu1  ;;  %v222_v31 = vadd.f32 %v214_v28, %v2561_v27 }
  0xe2   :  { %v223_v32 = vadd.f32 %v219_v29, %v2559_v26 }
  0xe4   :  { %2372 = vtanh.f32 %v223_v32 }
  0xe5   :  { %2374 = vtanh.f32 %v222_v31 }
  0xee   :  { %v2373_v33 = vpop.eup %2372 }
  0xef   :  { %v228_v34 = vrot.slane %v2373_v33, 7  ;;  %v2375_v35 = vpop.eup %2374 }
  0xf1   :  { %v230_v36 = vsel %vm229_vm3, %v228_v34, %v2375_v35 }
  0xf2   :  { %2003 = vmatmul.mubr.msk.f32.vlgmr.msra.gmra.mrb[2].mxu1 %vm144_vm4, %v230_v36  ;;  %v232_v37 = vsel %vm144_vm4, %v230_v36, 0.0 }
  0xf3   :  { %1992 = vmatmul.mubr.msk.f32.vlgmr.msra.gmra.mrb[2].mxu0 %vm233_vm5, %v232_v37  ;;  %2241 = vmatpush3.bf16.msra.mxu1 %v2522_v13 }
  0xf4   :  { %2253 = vmatpush3.bf16.msra.mxu0 %v2480_v4  ;;  %2032 = vmatprep.mubr.msk.f32.mxu0 %vm2421_vm2, %v2422_v8 }
  0xf5   :  { %2254 = vmatprep.subr.bf16.mxu0 %v2420_v0  ;;  %2242 = vmatprep.subr.bf16.mxu1 %v2420_v0 }
  0xf6   :  { %2021 = vmatprep.mubr.msk.f32.mxu1 %vm2421_vm2, %v2422_v8 }
  0xf7   :  { %2244 = vmatpush3.bf16.msra.mxu1 %v2532_v16 }
  0xf8   :  { %2256 = vmatpush3.bf16.msra.mxu0 %v2501_v10  ;;  %2245 = vmatprep.subr.bf16.mxu1 %v2420_v0 }
  0xf9   :  { %2257 = vmatprep.subr.bf16.mxu0 %v2420_v0 }
  0xfb   :  { %2247 = vmatpush3.bf16.msra.mxu1 %v2542_v19 }
  0xfc   :  { %2248 = vmatprep.subr.bf16.mxu1 %v2420_v0 }
  0xff   :  { %2250 = vmatpush3.bf16.msra.mxu1 %v2552_v22 }
 0x100   :  { %2269 = vmatprep.subr.bf16.mxu1 %v2420_v0 }
 0x1c5   :  { %v404_v39 = vpop.f32.mrb[2].mxu1 }
 0x1c6   :  { %v409_v40 = vrot.slane %v404_v39, 7  ;;  %v413_v41 = vadd.f32 %v404_v39, %v2559_v26  ;;  %v303_v42 = vpop.f32.mrb[2].mxu0  ;;  %v2004_v43 = vpop.f32.mrb[3].mxu1 }
 0x1c7   :  { %v304_v44 = vadd.f32 %v2588_v38, %v303_v42  ;;  %v1993_v45 = vpop.f32.mrb[3].mxu0 }
 0x1c8   :  { %v412_v46 = vadd.f32 %v409_v40, %v2561_v27  ;;  %2376 = vtanh.f32 %v413_v41 }
 0x1c9   :  { %2378 = vtanh.f32 %v304_v44 }
 0x1ca   :  { %2380 = vtanh.f32 %v412_v46 }
 0x1d2   :  { %v2377_v53 = vpop.eup %2376 }
 0x1d3   :  { %v2379_v54 = vpop.eup %2378  ;;  %v418_v55 = vrot.slane %v2377_v53, 7 }
 0x1d4   :  { %v2381_v56 = vpop.eup %2380  ;;  %v315_v57 = vrot.slane %v2379_v54, %v2593_v52  ;;  %v422_v58 = vrot.slane %v2379_v54, 7 }
 0x1d5   :  { %v529_v59 = vrot.slane %v2381_v56, 1  ;;  %v420_v60 = vsel %vm419_vm6, %v418_v55, %v2381_v56 }
 0x1d6   :  { %v316_v61 = vcombine.high %v315_v57, %v315_v57  ;;  %v323_v62 = vrot.slane %v315_v57, %v2593_v52  ;;  %423 = vrot.lane.b32.xlu0 %v422_v58, %s2424_s5 }
 0x1d7   :  { %v530_v63 = vsel %vm229_vm3, %v2377_v53, %v529_v59 }
 0x1d8   :  { %v330_v1 = vrot.slane %v316_v61, %v2593_v52  ;;  %334 = vst.msk [vmem:[#allocation2] sm:$0x1] %vm333_vm7, %v323_v62  ;;  %2033 = vmatmul.mubr.msk.f32.vlgmr.msra.gmra.mrb[4].mxu0 %vm144_vm4, %v530_v63 }
 0x1d9   :  { %2259 = vmatpush3.bf16.msra.mxu0 %v2522_v13  ;;  %2051 = vmatprep.mubr.msk.f32.mxu0 %vm2421_vm2, %v2422_v8 }
 0x1da   :  { %335 = vst.msk [vmem:[#allocation2 + $0x8] sm:$0x1] %vm333_vm7, %v330_v1  ;;  %2260 = vmatprep.subr.bf16.mxu0 %v2420_v0 }
 0x1dd   :  { %2262 = vmatpush3.bf16.msra.mxu0 %v2532_v16 }
 0x1de   :  { %2263 = vmatprep.subr.bf16.mxu0 %v2420_v0 }
 0x1e1   :  { %2265 = vmatpush3.bf16.msra.mxu0 %v2542_v19 }
 0x1e2   :  { %2266 = vmatprep.subr.bf16.mxu0 %v2420_v0 }
 0x1e5   :  { %2268 = vmatpush3.bf16.msra.mxu0 %v2552_v22 }
 0x1e6   :  { %2287 = vmatprep.subr.bf16.mxu0 %v2420_v0 }
 0x248   :  { %v424_v2 = vpop.permute.xlu0 %423 }
 0x249   :  { %v426_v3 = vsel %vm144_vm4, %v420_v60, %v424_v2 }
 0x24a   :  { %v428_v5 = vrot.slane %v426_v3, 1 }
 0x24c   :  { %2022 = vmatmul.mubr.msk.f32.vlgmr.msra.gmra.mrb[4].mxu1 %vm233_vm5, %v428_v5 }
 0x24d   :  { %2271 = vmatpush3.bf16.msra.mxu1 %v2480_v4  ;;  %2062 = vmatprep.mubr.msk.f32.mxu1 %vm2421_vm2, %v2422_v8 }
 0x24e   :  { %2272 = vmatprep.subr.bf16.mxu1 %v2420_v0 }
 0x251   :  { %2274 = vmatpush3.bf16.msra.mxu1 %v2501_v10 }
 0x252   :  { %2275 = vmatprep.subr.bf16.mxu1 %v2420_v0 }
 0x2ab   :  { %v599_v6 = vpop.f32.mrb[4].mxu0 }
 0x2ac   :  { %v604_v7 = vrot.slane %v599_v6, 6  ;;  %v605_v9 = vrot.slane %v599_v6, 7  ;;  %v2034_v11 = vpop.f32.mrb[5].mxu0 }
 0x2ae   :  { %v608_v12 = vadd.f32 %v604_v7, %v2561_v27  ;;  %v609_v14 = vadd.f32 %v605_v9, %v2559_v26 }
 0x2b0   :  { %2382 = vtanh.f32 %v608_v12 }
 0x2b1   :  { %2384 = vtanh.f32 %v609_v14 }
 0x2ba   :  { %v2383_v15 = vpop.eup %2382 }
 0x2bb   :  { %v2385_v17 = vpop.eup %2384  ;;  %v725_v18 = vrot.slane %v2383_v15, 2 }
 0x2bc   :  { %v726_v20 = vrot.slane %v2385_v17, 1  ;;  %v614_v21 = vrot.slane %v2385_v17, 7 }
 0x2be   :  { %v727_v23 = vsel %vm229_vm3, %v726_v20, %v725_v18  ;;  %v616_v24 = vsel %vm615_vm8, %v614_v21, %v2383_v15 }
 0x2bf   :  { %2063 = vmatmul.mubr.msk.f32.vlgmr.msra.gmra.mrb[6].mxu1 %vm144_vm4, %v727_v23 }
 0x2c0   :  { %2277 = vmatpush3.bf16.msra.mxu1 %v2522_v13  ;;  %2081 = vmatprep.mubr.msk.f32.mxu1 %vm2421_vm2, %v2422_v8 }
 0x2c1   :  { %2278 = vmatprep.subr.bf16.mxu1 %v2420_v0 }
 0x2c4   :  { %2280 = vmatpush3.bf16.msra.mxu1 %v2532_v16 }
 0x2c5   :  { %2281 = vmatprep.subr.bf16.mxu1 %v2420_v0 }
 0x2c8   :  { %2283 = vmatpush3.bf16.msra.mxu1 %v2542_v19 }
 0x2c9   :  { %2284 = vmatprep.subr.bf16.mxu1 %v2420_v0 }
 0x2cc   :  { %2286 = vmatpush3.bf16.msra.mxu1 %v2552_v22 }
 0x2cd   :  { %2305 = vmatprep.subr.bf16.mxu1 %v2420_v0 }
 0x31f   :  { %v497_v25 = vpop.f32.mrb[4].mxu1 }
 0x320   :  { %v498_v28 = vadd.f32 %v2588_v38, %v497_v25  ;;  %v2023_v29 = vpop.f32.mrb[5].mxu1 }
 0x322   :  { %2386 = vtanh.f32 %v498_v28 }
 0x32c   :  { %v2387_v30 = vpop.eup %2386 }
 0x32d   :  { %v509_v31 = vrot.slane %v2387_v30, %v2593_v52  ;;  %v618_v32 = vrot.slane %v2387_v30, 6 }
 0x32f   :  { %v510_v33 = vcombine.high %v509_v31, %v509_v31  ;;  %v517_v34 = vrot.slane %v509_v31, %v2593_v52  ;;  %619 = vrot.lane.b32.xlu0 %v618_v32, %s2424_s5 }
 0x331   :  { %v524_v35 = vrot.slane %v510_v33, %v2593_v52  ;;  %527 = vst.msk [vmem:[#allocation2 + $0x1] sm:$0x1] %vm333_vm7, %v517_v34 }
 0x333   :  { %528 = vst.msk [vmem:[#allocation2 + $0x9] sm:$0x1] %vm333_vm7, %v524_v35 }
 0x392   :  { %v796_v36 = vpop.f32.mrb[6].mxu1 }
 0x393   :  { %v801_v37 = vrot.slane %v796_v36, 5  ;;  %v802_v39 = vrot.slane %v796_v36, 6  ;;  %v2064_v40 = vpop.f32.mrb[7].mxu1 }
 0x395   :  { %v806_v41 = vadd.f32 %v802_v39, %v2559_v26  ;;  %v805_v42 = vadd.f32 %v801_v37, %v2561_v27 }
 0x397   :  { %2388 = vtanh.f32 %v806_v41 }
 0x398   :  { %2390 = vtanh.f32 %v805_v42 }
 0x3a1   :  { %v620_v43 = vpop.permute.xlu0 %619  ;;  %v2389_v44 = vpop.eup %2388 }
 0x3a2   :  { %v622_v45 = vsel %vm144_vm4, %v616_v24, %v620_v43  ;;  %v811_v47 = vrot.slane %v2389_v44, 7  ;;  %v2391_v48 = vpop.eup %2390  ;;  %v923_v51 = vrot.slane %v2389_v44, 2 }
 0x3a3   :  { %v624_v46 = vrot.slane %v622_v45, 2  ;;  %v922_v50 = vrot.slane %v2391_v48, 3 }
 0x3a4   :  { %v813_v49 = vsel %vm812_vm9, %v811_v47, %v2391_v48 }
 0x3a5   :  { %2052 = vmatmul.mubr.msk.f32.vlgmr.msra.gmra.mrb[6].mxu0 %vm233_vm5, %v624_v46  ;;  %v924_v53 = vsel %vm229_vm3, %v923_v51, %v922_v50 }
 0x3a6   :  { %2289 = vmatpush3.bf16.msra.mxu0 %v2480_v4  ;;  %2092 = vmatprep.mubr.msk.f32.mxu0 %vm2421_vm2, %v2422_v8 }
 0x3a7   :  { %2290 = vmatprep.subr.bf16.mxu0 %v2420_v0 }
 0x3aa   :  { %2292 = vmatpush3.bf16.msra.mxu0 %v2501_v10 }
 0x3ab   :  { %2293 = vmatprep.subr.bf16.mxu0 %v2420_v0 }
 0x3ad   :  { %2093 = vmatmul.mubr.msk.f32.vlgmr.msra.gmra.mrb[8].mxu0 %vm144_vm4, %v924_v53 }
 0x3ae   :  { %2295 = vmatpush3.bf16.msra.mxu0 %v2522_v13  ;;  %2111 = vmatprep.mubr.msk.f32.mxu0 %vm2421_vm2, %v2422_v8 }
 0x3af   :  { %2296 = vmatprep.subr.bf16.mxu0 %v2420_v0 }
 0x3b2   :  { %2298 = vmatpush3.bf16.msra.mxu0 %v2532_v16 }
 0x3b3   :  { %2299 = vmatprep.subr.bf16.mxu0 %v2420_v0 }
 0x3b6   :  { %2301 = vmatpush3.bf16.msra.mxu0 %v2542_v19 }
 0x3b7   :  { %2302 = vmatprep.subr.bf16.mxu0 %v2420_v0 }
 0x3ba   :  { %2304 = vmatpush3.bf16.msra.mxu0 %v2552_v22 }
 0x3bb   :  { %2323 = vmatprep.subr.bf16.mxu0 %v2420_v0 }
 0x478   :  { %v693_v54 = vpop.f32.mrb[6].mxu0 }
 0x479   :  { %v694_v55 = vadd.f32 %v2588_v38, %v693_v54  ;;  %v2053_v56 = vpop.f32.mrb[7].mxu0 }
 0x47b   :  { %2392 = vtanh.f32 %v694_v55 }
 0x480   :  { %v993_v57 = vpop.f32.mrb[8].mxu0 }
 0x481   :  { %v998_v58 = vrot.slane %v993_v57, 4  ;;  %v999_v59 = vrot.slane %v993_v57, 5  ;;  %v2094_v60 = vpop.f32.mrb[9].mxu0 }
 0x483   :  { %v1003_v61 = vadd.f32 %v999_v59, %v2559_v26  ;;  %v1002_v62 = vadd.f32 %v998_v58, %v2561_v27 }
 0x485   :  { %v2393_v63 = vpop.eup %2392  ;;  %2394 = vtanh.f32 %v1003_v61 }
 0x486   :  { %v705_v1 = vrot.slane %v2393_v63, %v2593_v52  ;;  %v815_v2 = vrot.slane %v2393_v63, 5  ;;  %2396 = vtanh.f32 %v1002_v62 }
 0x488   :  { %v706_v3 = vcombine.high %v705_v1, %v705_v1  ;;  %v713_v5 = vrot.slane %v705_v1, %v2593_v52  ;;  %816 = vrot.lane.b32.xlu1 %v815_v2, %s2424_s5 }
 0x48a   :  { %v720_v6 = vrot.slane %v706_v3, %v2593_v52  ;;  %723 = vst.msk [vmem:[#allocation2 + $0x2] sm:$0x1] %vm333_vm7, %v713_v5 }
 0x48c   :  { %724 = vst.msk [vmem:[#allocation2 + $0xa] sm:$0x1] %vm333_vm7, %v720_v6 }
 0x48f   :  { %v2395_v7 = vpop.eup %2394 }
 0x490   :  { %v1008_v9 = vrot.slane %v2395_v7, 7  ;;  %v2397_v11 = vpop.eup %2396  ;;  %v1120_v20 = vrot.slane %v2395_v7, 3 }
 0x491   :  { %v1119_v18 = vrot.slane %v2397_v11, 4 }
 0x492   :  { %v1010_v12 = vsel %vm1009_vm10, %v1008_v9, %v2397_v11 }
 0x493   :  { %v1121_v21 = vsel %vm229_vm3, %v1120_v20, %v1119_v18 }
 0x4fa   :  { %v817_v14 = vpop.permute.xlu1 %816 }
 0x4fb   :  { %v819_v15 = vsel %vm144_vm4, %v813_v49, %v817_v14 }
 0x4fc   :  { %v821_v17 = vrot.slane %v819_v15, 3 }
 0x4fe   :  { %2082 = vmatmul.mubr.msk.f32.vlgmr.msra.gmra.mrb[8].mxu1 %vm233_vm5, %v821_v17 }
 0x4ff   :  { %2307 = vmatpush3.bf16.msra.mxu1 %v2480_v4  ;;  %2122 = vmatprep.mubr.msk.f32.mxu1 %vm2421_vm2, %v2422_v8 }
 0x500   :  { %2308 = vmatprep.subr.bf16.mxu1 %v2420_v0 }
 0x503   :  { %2310 = vmatpush3.bf16.msra.mxu1 %v2501_v10 }
 0x504   :  { %2311 = vmatprep.subr.bf16.mxu1 %v2420_v0 }
 0x506   :  { %2123 = vmatmul.mubr.msk.f32.vlgmr.msra.gmra.mrb[10].mxu1 %vm144_vm4, %v1121_v21 }
 0x507   :  { %2313 = vmatpush3.bf16.msra.mxu1 %v2522_v13  ;;  %2141 = vmatprep.mubr.msk.f32.mxu1 %vm2421_vm2, %v2422_v8 }
 0x508   :  { %2314 = vmatprep.subr.bf16.mxu1 %v2420_v0 }
 0x50b   :  { %2316 = vmatpush3.bf16.msra.mxu1 %v2532_v16 }
 0x50c   :  { %2317 = vmatprep.subr.bf16.mxu1 %v2420_v0 }
 0x50f   :  { %2319 = vmatpush3.bf16.msra.mxu1 %v2542_v19 }
 0x510   :  { %2320 = vmatprep.subr.bf16.mxu1 %v2420_v0 }
 0x513   :  { %2322 = vmatpush3.bf16.msra.mxu1 %v2552_v22 }
 0x514   :  { %2341 = vmatprep.subr.bf16.mxu1 %v2420_v0 }
 0x5d1   :  { %v890_v23 = vpop.f32.mrb[8].mxu1 }
 0x5d2   :  { %v891_v24 = vadd.f32 %v2588_v38, %v890_v23  ;;  %v2083_v25 = vpop.f32.mrb[9].mxu1 }
 0x5d4   :  { %2398 = vtanh.f32 %v891_v24 }
 0x5d9   :  { %v1190_v28 = vpop.f32.mrb[10].mxu1 }
 0x5da   :  { %v1195_v29 = vrot.slane %v1190_v28, 3  ;;  %v1196_v30 = vrot.slane %v1190_v28, 4  ;;  %v2124_v31 = vpop.f32.mrb[11].mxu1 }
 0x5dc   :  { %v1200_v32 = vadd.f32 %v1196_v30, %v2559_v26  ;;  %v1199_v33 = vadd.f32 %v1195_v29, %v2561_v27 }
 0x5de   :  { %v2399_v34 = vpop.eup %2398  ;;  %2400 = vtanh.f32 %v1200_v32 }
 0x5df   :  { %v902_v35 = vrot.slane %v2399_v34, %v2593_v52  ;;  %v1012_v36 = vrot.slane %v2399_v34, 4  ;;  %2402 = vtanh.f32 %v1199_v33 }
 0x5e1   :  { %v903_v37 = vcombine.high %v902_v35, %v902_v35  ;;  %v910_v39 = vrot.slane %v902_v35, %v2593_v52  ;;  %1013 = vrot.lane.b32.xlu1 %v1012_v36, %s2424_s5 }
 0x5e3   :  { %v917_v40 = vrot.slane %v903_v37, %v2593_v52  ;;  %920 = vst.msk [vmem:[#allocation2 + $0x3] sm:$0x1] %vm333_vm7, %v910_v39 }
 0x5e5   :  { %921 = vst.msk [vmem:[#allocation2 + $0xb] sm:$0x1] %vm333_vm7, %v917_v40 }
 0x5e8   :  { %v2401_v41 = vpop.eup %2400 }
 0x5e9   :  { %v1205_v42 = vrot.slane %v2401_v41, 7  ;;  %v2403_v43 = vpop.eup %2402  ;;  %v1317_v49 = vrot.slane %v2401_v41, 4 }
 0x5ea   :  { %v1316_v48 = vrot.slane %v2403_v43, 5 }
 0x5eb   :  { %v1207_v44 = vsel %vm1206_vm11, %v1205_v42, %v2403_v43 }
 0x5ec   :  { %v1318_v50 = vsel %vm229_vm3, %v1317_v49, %v1316_v48 }
 0x653   :  { %v1014_v45 = vpop.permute.xlu1 %1013 }
 0x654   :  { %v1016_v46 = vsel %vm144_vm4, %v1010_v12, %v1014_v45 }
 0x655   :  { %v1018_v47 = vrot.slane %v1016_v46, 4 }
 0x657   :  { %2112 = vmatmul.mubr.msk.f32.vlgmr.msra.gmra.mrb[10].mxu0 %vm233_vm5, %v1018_v47 }
 0x658   :  { %2325 = vmatpush3.bf16.msra.mxu0 %v2480_v4  ;;  %2152 = vmatprep.mubr.msk.f32.mxu0 %vm2421_vm2, %v2422_v8 }
 0x659   :  { %2326 = vmatprep.subr.bf16.mxu0 %v2420_v0 }
 0x65c   :  { %2328 = vmatpush3.bf16.msra.mxu0 %v2501_v10 }
 0x65d   :  { %2329 = vmatprep.subr.bf16.mxu0 %v2420_v0 }
 0x65f   :  { %2153 = vmatmul.mubr.msk.f32.vlgmr.msra.gmra.mrb[12].mxu0 %vm144_vm4, %v1318_v50 }
 0x660   :  { %2331 = vmatpush3.bf16.msra.mxu0 %v2522_v13  ;;  %2171 = vmatprep.mubr.msk.f32.mxu0 %vm2421_vm2, %v2422_v8 }
 0x661   :  { %2332 = vmatprep.subr.bf16.mxu0 %v2420_v0 }
 0x664   :  { %2334 = vmatpush3.bf16.msra.mxu0 %v2532_v16 }
 0x665   :  { %2335 = vmatprep.subr.bf16.mxu0 %v2420_v0 }
 0x668   :  { %2337 = vmatpush3.bf16.msra.mxu0 %v2542_v19 }
 0x669   :  { %2338 = vmatprep.subr.bf16.mxu0 %v2420_v0 }
 0x66c   :  { %2340 = vmatpush3.bf16.msra.mxu0 %v2552_v22 }
 0x72a   :  { %v1087_v51 = vpop.f32.mrb[10].mxu0 }
 0x72b   :  { %v1088_v53 = vadd.f32 %v2588_v38, %v1087_v51  ;;  %v2113_v54 = vpop.f32.mrb[11].mxu0 }
 0x72c   :  { %v1718_v54 = vld [vmem:[%s2805_s6 + $0x10] sm:$0xff] }
 0x72d   :  { %2404 = vtanh.f32 %v1088_v53 }
 0x732   :  { %v1387_v55 = vpop.f32.mrb[12].mxu0 }
 0x733   :  { %v1392_v56 = vrot.slane %v1387_v55, 2  ;;  %v1393_v57 = vrot.slane %v1387_v55, 3  ;;  %v2154_v58 = vpop.f32.mrb[13].mxu0  ;;  %v1719_v55 = vld [vmem:[%s2805_s6 + $0x18] sm:$0xff] }
 0x735   :  { %v1397_v59 = vadd.f32 %v1393_v57, %v2559_v26  ;;  %v1396_v60 = vadd.f32 %v1392_v56, %v2561_v27  ;;  %v2363_v56 = vpack.c.bf16 %v1719_v55, %v1718_v54 }
 0x737   :  { %v2405_v61 = vpop.eup %2404  ;;  %2406 = vtanh.f32 %v1397_v59 }
 0x738   :  { %v1099_v62 = vrot.slane %v2405_v61, %v2593_v52  ;;  %v1209_v63 = vrot.slane %v2405_v61, 3  ;;  %2408 = vtanh.f32 %v1396_v60 }
 0x73a   :  { %v1100_v1 = vcombine.high %v1099_v62, %v1099_v62  ;;  %v1107_v2 = vrot.slane %v1099_v62, %v2593_v52  ;;  %1210 = vrot.lane.b32.xlu0 %v1209_v63, %s2424_s5 }
 0x73c   :  { %v1114_v3 = vrot.slane %v1100_v1, %v2593_v52  ;;  %1117 = vst.msk [vmem:[#allocation2 + $0x4] sm:$0x1] %vm333_vm7, %v1107_v2 }
 0x73e   :  { %1118 = vst.msk [vmem:[#allocation2 + $0xc] sm:$0x1] %vm333_vm7, %v1114_v3 }
 0x741   :  { %v2407_v5 = vpop.eup %2406 }
 0x742   :  { %v1402_v6 = vrot.slane %v2407_v5, 7  ;;  %v2409_v7 = vpop.eup %2408  ;;  %v1514_v17 = vrot.slane %v2407_v5, 5 }
 0x743   :  { %v1513_v15 = vrot.slane %v2409_v7, 6 }
 0x744   :  { %v1404_v9 = vsel %vm1403_vm12, %v1402_v6, %v2409_v7 }
 0x745   :  { %v1515_v18 = vsel %vm229_vm3, %v1514_v17, %v1513_v15 }
 0x7ac   :  { %v1211_v11 = vpop.permute.xlu0 %1210 }
 0x7ad   :  { %v1213_v12 = vsel %vm144_vm4, %v1207_v44, %v1211_v11 }
 0x7ae   :  { %v1215_v14 = vrot.slane %v1213_v12, 5 }
 0x7b0   :  { %2142 = vmatmul.mubr.msk.f32.vlgmr.msra.gmra.mrb[12].mxu1 %vm233_vm5, %v1215_v14 }
 0x7b1   :  { %2343 = vmatpush3.bf16.msra.mxu1 %v2480_v4  ;;  %2182 = vmatprep.mubr.msk.f32.mxu1 %vm2421_vm2, %v2422_v8 }
 0x7b2   :  { %2344 = vmatprep.subr.bf16.mxu1 %v2420_v0 }
 0x7b5   :  { %2346 = vmatpush3.bf16.msra.mxu1 %v2501_v10 }
 0x7b6   :  { %2347 = vmatprep.subr.bf16.mxu1 %v2420_v0 }
 0x7b8   :  { %2183 = vmatmul.mubr.msk.f32.vlgmr.msra.gmra.mrb[14].mxu1 %vm144_vm4, %v1515_v18 }
 0x7b9   :  { %2349 = vmatpush3.bf16.msra.mxu1 %v2522_v13  ;;  %2201 = vmatprep.mubr.msk.f32.mxu1 %vm2421_vm2, %v2422_v8 }
 0x7ba   :  { %2350 = vmatprep.subr.bf16.mxu1 %v2420_v0 }
 0x7bd   :  { %2352 = vmatpush3.bf16.msra.mxu1 %v2532_v16 }
 0x7be   :  { %2353 = vmatprep.subr.bf16.mxu1 %v2420_v0 }
 0x7c1   :  { %2355 = vmatpush3.bf16.msra.mxu1 %v2542_v19 }
 0x7c2   :  { %2356 = vmatprep.subr.bf16.mxu1 %v2420_v0 }
 0x7c5   :  { %2358 = vmatpush3.bf16.msra.mxu1 %v2552_v22 }
 0x883   :  { %v1284_v4 = vpop.f32.mrb[12].mxu1 }
 0x884   :  { %v1285_v10 = vadd.f32 %v2588_v38, %v1284_v4  ;;  %v2143_v20 = vpop.f32.mrb[13].mxu1 }
 0x886   :  { %2410 = vtanh.f32 %v1285_v10 }
 0x88b   :  { %v1584_v13 = vpop.f32.mrb[14].mxu1 }
 0x88c   :  { %v2184_v21 = vpop.f32.mrb[15].mxu1  ;;  %v1590_v39 = vrot.slane %v1584_v13, 2  ;;  %v1589_v40 = vrot.slane %v1584_v13, 1 }
 0x88e   :  { %v1594_v41 = vadd.f32 %v1590_v39, %v2559_v26  ;;  %v1593_v42 = vadd.f32 %v1589_v40, %v2561_v27  ;;  %v1716_v26 = vld [vmem:[%s2805_s6] sm:$0xff]  ;;  %v1717_v27 = vld [vmem:[%s2805_s6 + $0x8] sm:$0xff] }
 0x88f   :  { %v2359_v53 = vpack.c.bf16 %v1717_v27, %v1716_v26 }
 0x890   :  { %v2411_v8 = vpop.eup %2410 }
 0x891   :  { %v1296_v23 = vrot.slane %v2411_v8, %v2593_v52  ;;  %v1406_v24 = vrot.slane %v2411_v8, 2  ;;  %2360 = vmatprep.subr.bf16.mxu0 %v2359_v53 }
 0x893   :  { %v1297_v16 = vcombine.high %v1296_v23, %v1296_v23  ;;  %v1304_v25 = vrot.slane %v1296_v23, %v2593_v52  ;;  %1407 = vrot.lane.b32.xlu1 %v1406_v24, %s2424_s5 }
 0x895   :  { %v1311_v0 = vrot.slane %v1297_v16, %v2593_v52  ;;  %1314 = vst.msk [vmem:[#allocation2 + $0x5] sm:$0x1] %vm333_vm7, %v1304_v25 }
 0x897   :  { %1315 = vst.msk [vmem:[#allocation2 + $0xd] sm:$0x1] %vm333_vm7, %v1311_v0 }
 0x905   :  { %v1408_v19 = vpop.permute.xlu1 %1407 }
 0x906   :  { %v1410_v22 = vsel %vm144_vm4, %v1404_v9, %v1408_v19 }
 0x907   :  { %v1412_v28 = vrot.slane %v1410_v22, 6 }
 0x909   :  { %2172 = vmatmul.mubr.msk.f32.vlgmr.msra.gmra.mrb[14].mxu0 %vm233_vm5, %v1412_v28 }
 0x90a   :  { %2362 = vmatpush3.bf16.msra.mxu0 %v2359_v53 }
 0x90b   :  { %2364 = vmatprep.subr.bf16.mxu0 %v2363_v56 }
 0x90e   :  { %2366 = vmatpush3.bf16.msra.mxu0 %v2363_v56 }
 0x9dc   :  { %v1481_v29 = vpop.f32.mrb[14].mxu0 }
 0x9dd   :  { %v1482_v30 = vadd.f32 %v2588_v38, %v1481_v29  ;;  %v2173_v31 = vpop.f32.mrb[15].mxu0 }
 0x9df   :  { %2412 = vtanh.f32 %v1482_v30 }
 0x9e0   :  { %2414 = vtanh.f32 %v1594_v41 }
 0x9e1   :  { %2416 = vtanh.f32 %v1593_v42 }
 0x9e9   :  { %v2413_v32 = vpop.eup %2412 }
 0x9ea   :  { %v1493_v33 = vrot.slane %v2413_v32, %v2593_v52  ;;  %v1602_v34 = vrot.slane %v2413_v32, 1  ;;  %v2415_v43 = vpop.eup %2414 }
 0x9eb   :  { %v1599_v44 = vrot.slane %v2415_v43, 7  ;;  %v2417_v45 = vpop.eup %2416 }
 0x9ec   :  { %v1494_v35 = vcombine.high %v1493_v33, %v1493_v33  ;;  %v1501_v36 = vrot.slane %v1493_v33, %v2593_v52  ;;  %1603 = vrot.lane.b32.xlu0 %v1602_v34, %s2424_s5 }
 0x9ee   :  { %v1508_v37 = vrot.slane %v1494_v35, %v2593_v52  ;;  %1511 = vst.msk [vmem:[#allocation2 + $0x6] sm:$0x1] %vm333_vm7, %v1501_v36 }
 0x9f0   :  { %1512 = vst.msk [vmem:[#allocation2 + $0xe] sm:$0x1] %vm333_vm7, %v1508_v37 }
 0xa5e   :  { %v1604_v46 = vpop.permute.xlu0 %1603 }
 0xa5f   :  { %v1606_v47 = vsel %vm144_vm4, %v2417_v45, %v1604_v46  ;;  %v1607_v48 = vsel %vm144_vm4, %v1599_v44, %v1604_v46 }
 0xa60   :  { %v1611_v49 = vrot.slane %v1606_v47, 7  ;;  %v1612_v50 = vrot.slane %v1607_v48, 7 }
 0xa62   :  { %v1613_v51 = vsel %vm1610_vm13, %v1611_v49, %v1612_v50 }
 0xa63   :  { %2202 = vmatmul.mubr.msk.f32.vlgmr.msra.gmra.mrb[16].mxu1 %vm233_vm5, %v1613_v51 }
 0xb36   :  { %v1682_v57 = vpop.f32.mrb[16].mxu1 }
 0xb37   :  { %v1683_v58 = vadd.f32 %v2588_v38, %v1682_v57  ;;  %v2203_v59 = vpop.f32.mrb[17].mxu1  ;;  %v1835_v38 = vld [vmem:[%s2806_s7] ss:$0 sm:$0xff] }
 0xb39   :  { %2418 = vtanh.f32 %v1683_v58 }
 0xb43   :  { %v2419_v60 = vpop.eup %2418 }
 0xb44   :  { %v1694_v61 = vrot.slane %v2419_v60, %v2593_v52 }
 0xb46   :  { %v1695_v62 = vcombine.high %v1694_v61, %v1694_v61  ;;  %v1702_v63 = vrot.slane %v1694_v61, %v2593_v52 }
 0xb48   :  { %v1709_v1 = vrot.slane %v1695_v62, %v2593_v52  ;;  %1712 = vst.msk [vmem:[#allocation2 + $0x7] sm:$0x1] %vm333_vm7, %v1702_v63 }
 0xb4a   :  { %1713 = vst.msk [vmem:[#allocation2 + $0xf] sm:$0x1] %vm333_vm7, %v1709_v1 }
 0xb4f   :  { %v1714_v2 = vld [vmem:[#allocation2] sm:$0xff] }
 0xb50   :  { %2212 = vmatprep.mubr.msk.f32.mxu0 %vm144_vm4, %v1714_v2 }
 0xb51   :  { %v1715_v3 = vld [vmem:[#allocation2 + $0x8] sm:$0xff] }
 0xb52   :  { %2213 = vmatmul.mubr.msk.f32.vlgmr.msra.gmra.mrb[16].mxu0 %vm144_vm4, %v1715_v3 }
 0xc25   :  { %v2214_v5 = vpop.f32.mrb[16].mxu0 }
 0xc26   :  { %v1805_v6 = vadd.f32 %v2214_v5, %v1835_v38  ;;  %v1799_v7 = vpop.f32.mrb[17].mxu0 }
 0xc27   :  { %v1800_v9 = vadd.f32 %v1835_v38, %v1799_v7 }
 0xc28   :  { %1810 = vst.msk [vmem:[%s2807_s8 + $0x8] sm:$0xff] %vm1808_vm14, %v1805_v6 }
 0xc29   :  { %1809 = vst.msk [vmem:[%s2807_s8] sm:$0xff] %vm1808_vm14, %v1800_v9 }

</bundles_post_ra>
